<compile_context>
chip_gen: v7x
topology: tpu7x:2x2x1
jax: 0.10.0
libtpu: 0.0.40
codegen_flags: <defaults>
</compile_context>

<pallas_src>
import functools

import numpy as np
import jax
import jax.numpy as jnp
from jax import lax
from jax.experimental import pallas as pl
from jax.experimental.pallas import tpu as pltpu


_LANE = 128
_CHUNK_ROWS = 32                     # int8-native sublane quantum; 4096 voxels/chunk
_CHUNK_VOX = _CHUNK_ROWS * _LANE


def _ce_weighted_kernel(x_ref, t_ref, cnt_ref, pcl_ref, *,
                        num_classes, chunk_rows, num_chunks):
    """One (split, sample, spatial-tile) grid step.

    x_ref:   (1, C, TR, 128)  logits block, native dtype
    t_ref:   (1, TR, 128)     int8 targets (-1 marks padded / out-of-range voxels)
    cnt_ref: (1, C, 128) f32  per-class voxel counts   (accumulated across tiles)
    pcl_ref: (1, C, 128) f32  per-class CE loss sums   (accumulated across tiles)
    """
    C = num_classes
    s = pl.program_id(2)

    @pl.when(s == 0)
    def _init():
        cnt_ref[...] = jnp.zeros_like(cnt_ref)
        pcl_ref[...] = jnp.zeros_like(pcl_ref)

    def chunk_body(j, carry):
        cnt_acc, pcl_acc = carry
        r0 = pl.multiple_of(j * chunk_rows, chunk_rows)
        t32 = t_ref[0, pl.ds(r0, chunk_rows), :].astype(jnp.int32)   # (CR, 128)

        # Single sweep over classes: each class chunk is loaded/cast once; the
        # running max and the target-logit gather stay in the native dtype
        # (packed bf16 VALU on v6e/v7x); `sel` is reused for counts + gather.
        xs = []
        m = None
        tgt = None
        new_cnt = list(cnt_acc)
        for c in range(C):
            xc = x_ref[0, c, pl.ds(r0, chunk_rows), :]               # (CR, 128)
            xs.append(xc)
            m = xc if m is None else jnp.maximum(m, xc)
            sel = t32 == c
            tgt = jnp.where(sel, xc, jnp.zeros_like(xc) if tgt is None else tgt)
            if c < C - 1:
                # one-hot partition: the last class's count is derived in the
                # wrapper as S - sum(others), so skip its reduce chain here.
                new_cnt[c] = cnt_acc[c] + jnp.sum(
                    sel.astype(jnp.float32), axis=0, keepdims=True)

        # log-sum-exp in f32 (exp/log run on the EUP and overlap the VPU work).
        m_f = m.astype(jnp.float32)
        se = jnp.exp(xs[0].astype(jnp.float32) - m_f)
        for c in range(1, C):
            se = se + jnp.exp(xs[c].astype(jnp.float32) - m_f)
        ce = m_f + jnp.log(se) - tgt.astype(jnp.float32)             # per-voxel CE
        # padded / garbage voxels carry t == -1 and never match any class below,
        # so Inf/NaN from garbage logits in ragged tiles never reaches the sums.

        new_pcl = [pcl_acc[c] + jnp.sum(jnp.where(t32 == c, ce, 0.0),
                                        axis=0, keepdims=True)       # recompute of
                   for c in range(C)]                                 # t==c is 1 VALU op
        return tuple(new_cnt), tuple(new_pcl)

    cnt0 = tuple(jnp.zeros((1, _LANE), jnp.float32) for _ in range(C - 1))
    pcl0 = tuple(jnp.zeros((1, _LANE), jnp.float32) for _ in range(C))
    cnt_fin, pcl_fin = lax.fori_loop(0, num_chunks, chunk_body, (cnt0, pcl0))

    # accumulator refs are touched once per tile (not per chunk); lane reduce
    # happens in the wrapper so the outputs stay lane-dense.
    for c in range(C - 1):
        cnt_ref[0, c:c + 1, :] += cnt_fin[c]
    for c in range(C):
        pcl_ref[0, c:c + 1, :] += pcl_fin[c]


def cross_entropy_loss_weighted(inputs, targets, *, block_rows=None, n_splits=None):
    """inputs: (N, C, *spatial) float logits; targets: (N, *spatial) int class ids."""
    N, C = int(inputs.shape[0]), int(inputs.shape[1])
    assert inputs.ndim in (4, 5), "expected NCHW or NCDHW logits"
    assert 2 <= C <= 127, "int8 target path requires 2 <= C <= 127"
    spatial = inputs.shape[2:]
    S = int(np.prod(spatial))
    itemsize = jnp.dtype(inputs.dtype).itemsize

    # ---- per-generation tile / VMEM budget ---------------------------------
    vmem_cap = 64 * 2 ** 20                     # conservative default (v7x-class)
    try:
        info = pltpu.get_tpu_info()
        vmem_cap = int(getattr(info, "vmem_capacity_bytes", vmem_cap))
    except Exception:
        pass
    if vmem_cap <= 80 * 2 ** 20:                # v7x: 64 MiB physical VMEM
        target_block_bytes = 8 * 2 ** 20
        vmem_ceiling = vmem_cap - 12 * 2 ** 20  # headroom for Mosaic scratch
    else:                                       # v5e / v6e: 128 MiB physical VMEM
        target_block_bytes = 16 * 2 ** 20
        vmem_ceiling = vmem_cap - 24 * 2 ** 20

    # ---- spatial layout: (rows, 128) voxels --------------------------------
    R = -(-S // _LANE)                          # rows of 128 voxels
    if block_rows is None:
        block_rows = target_block_bytes // (C * itemsize * _LANE)
    block_rows = max(_CHUNK_ROWS, (block_rows // _CHUNK_ROWS) * _CHUNK_ROWS)
    block_rows = min(block_rows, max(_CHUNK_ROWS, (R // _CHUNK_ROWS) * _CHUNK_ROWS))
    num_tiles = -(-R // block_rows)
    last_block = num_tiles - 1

    if n_splits is None:
        # extra "parallel" axis so v7x's second TensorCore is busy at N == 1 / odd N
        n_splits = 2 if (N % 2 == 1 and num_tiles >= 2) else 1
    n_splits = max(1, min(int(n_splits), num_tiles))
    grid_tiles = -(-num_tiles // n_splits) * n_splits
    tiles_per_split = grid_tiles // n_splits

    # logits: flatten spatial dims and view as (N, C, rows, 128) in the native
    # dtype.  Zero-copy when S is 128-aligned (typical 3D-UNet volumes, incl. the
    # review-flagged 5x32x32 case); otherwise only the <128-voxel remainder is
    # padded (tiny inputs with R < 32 rows pad up to one chunk).
    x = inputs.reshape(N, C, S)
    rows_x = max(R, block_rows)
    if rows_x * _LANE != S:
        x = jnp.pad(x, ((0, 0), (0, 0), (0, rows_x * _LANE - S)))
    x4 = x.reshape(N, C, rows_x, _LANE)

    # targets: int8 (-1 == "padded voxel, matches no class"), padded to the full
    # tile grid so ragged / phantom tiles are masked.  ~16x cheaper than padding
    # the logits.
    # TODO(synk): if the dataset ever uses an ignore/void label, the -1 sentinel
    # and the analytic last-class count below must be revisited.
    rows_t = grid_tiles * block_rows
    t = targets.reshape(N, S).astype(jnp.int8)
    if rows_t * _LANE != S:
        t = jnp.pad(t, ((0, 0), (0, rows_t * _LANE - S)), constant_values=-1)
    t3 = t.reshape(N, rows_t, _LANE)

    # explicit VMEM budget: double-buffered input blocks + headroom (the chunked
    # kernel keeps its temporaries in vregs, so no full-tile f32 buffers).
    x_block_bytes = C * block_rows * _LANE * itemsize
    t_block_bytes = block_rows * _LANE
    need = 2 * (x_block_bytes + t_block_bytes) + 4 * 2 ** 20
    vmem_limit = int(min(max(need, 32 * 2 ** 20), max(vmem_ceiling, need)))

    kernel = functools.partial(_ce_weighted_kernel, num_classes=C,
                               chunk_rows=_CHUNK_ROWS,
                               num_chunks=block_rows // _CHUNK_ROWS)

    def x_map(h, n, s):
        blk = h * tiles_per_split + s
        # phantom tiles (tile count rounded up to the split) re-read the last
        # valid block; their targets are all -1 so they contribute zero.
        return (n, 0, jnp.minimum(blk, last_block), 0)

    def t_map(h, n, s):
        return (n, h * tiles_per_split + s, 0)

    def o_map(h, n, s):
        return (h * N + n, 0, 0)

    cnt_out, pcl_out = pl.pallas_call(
        kernel,
        out_shape=(jax.ShapeDtypeStruct((n_splits * N, C, _LANE), jnp.float32),
                   jax.ShapeDtypeStruct((n_splits * N, C, _LANE), jnp.float32)),
        grid_spec=pltpu.PrefetchScalarGridSpec(
            num_scalar_prefetch=0,
            grid=(n_splits, N, tiles_per_split),
            in_specs=[
                pl.BlockSpec((1, C, block_rows, _LANE), x_map),
                pl.BlockSpec((1, block_rows, _LANE), t_map),
            ],
            out_specs=[
                pl.BlockSpec((1, C, _LANE), o_map),
                pl.BlockSpec((1, C, _LANE), o_map),
            ],
        ),
        compiler_params=pltpu.CompilerParams(
            dimension_semantics=("parallel", "parallel", "arbitrary"),
            vmem_limit_bytes=vmem_limit,
        ),
    )(x4, t3)

    # ---- tiny finalize in plain JAX ----------------------------------------
    cnt = jnp.sum(cnt_out.reshape(n_splits, N, C, _LANE), axis=(0, 3))   # (N, C)
    pcl = jnp.sum(pcl_out.reshape(n_splits, N, C, _LANE), axis=(0, 3))   # (N, C)
    # one-hot partition: last class count = S - sum(others) per sample.
    cnt = cnt.at[:, C - 1].set(jnp.float32(S) - jnp.sum(cnt[:, :C - 1], axis=1))
    total = jnp.sum(cnt)                              # == N * S for valid targets
    weights = 1.0 - cnt / total                       # (N, C)
    loss_sum = jnp.sum(weights * pcl)
    w_sum = jnp.sum(weights)

    # quirk of the original module: `size` uses only the first (and, for 5-D
    # input, the second) spatial dim, not the full voxel count.  Reproduced.
    size = N * int(spatial[0])
    if inputs.ndim == 5:
        size *= int(spatial[1])
    return (loss_sum / (w_sum * jnp.float32(size))).astype(inputs.dtype)


def _reference(inputs, targets):
    """Pure-JAX transcription of the PyTorch forward, for verification."""
    N, C = inputs.shape[0], inputs.shape[1]
    spatial = inputs.shape[2:]
    x = inputs.astype(jnp.float32)
    oh = jax.nn.one_hot(targets, C, axis=1, dtype=jnp.float32)          # (N,C,*sp)
    weights = 1.0 - jnp.sum(oh, axis=tuple(range(2, x.ndim)), keepdims=True) / jnp.sum(oh)
    oh_w = weights * oh
    logp = jax.nn.log_softmax(x, axis=1)
    ce = -jnp.take_along_axis(logp, targets[:, None].astype(jnp.int32), axis=1)
    loss = ce * oh_w
    size = N * spatial[0]
    if x.ndim == 5:
        size *= spatial[1]
    return jnp.sum(loss) / (jnp.sum(weights) * size)


if __name__ == "__main__":
    key = jax.random.PRNGKey(0)
    k1, k2, k3, k4, k5, k6 = jax.random.split(key, 6)

    # 5-D NCDHW (3D-UNet style).  S = 5*32*32 = 5120 is 128-aligned -> zero-copy
    # logits path (the case flagged by the review).  block_rows=32 forces two
    # spatial tiles; run both the single-core accumulation path (n_splits=1) and
    # the spatial-split parallel path (n_splits=2).
    N, C, D, H, W = 2, 4, 5, 32, 32
    x5 = jax.random.normal(k1, (N, C, D, H, W), dtype=jnp.float32)
    t5 = jax.random.randint(k2, (N, D, H, W), 0, C, dtype=jnp.int32)
    ref5 = np.asarray(_reference(x5, t5))
    out5a = jax.block_until_ready(
        cross_entropy_loss_weighted(x5, t5, block_rows=32, n_splits=1))
    np.testing.assert_allclose(np.asarray(out5a), ref5, rtol=2e-5, atol=1e-6)
    out5b = jax.block_until_ready(
        cross_entropy_loss_weighted(x5, t5, block_rows=32, n_splits=2))
    np.testing.assert_allclose(np.asarray(out5b), ref5, rtol=2e-5, atol=1e-6)

    # batch 1, odd tile count + split -> exercises the clamped phantom-tile path.
    x1 = jax.random.normal(k3, (1, 4, 9, 32, 32), dtype=jnp.float32)
    t1 = jax.random.randint(k4, (1, 9, 32, 32), 0, 4, dtype=jnp.int32)
    out1 = jax.block_until_ready(
        cross_entropy_loss_weighted(x1, t1, block_rows=32, n_splits=2))
    np.testing.assert_allclose(np.asarray(out1), np.asarray(_reference(x1, t1)),
                               rtol=2e-5, atol=1e-6)

    # 4-D NCHW, odd batch / class count, S = 576 not 128-aligned (ragged tail),
    # default per-generation tiling and split selection.
    N2, C2, H2, W2 = 3, 3, 24, 24
    x4 = jax.random.normal(k5, (N2, C2, H2, W2), dtype=jnp.float32)
    t4 = jax.random.randint(k6, (N2, H2, W2), 0, C2, dtype=jnp.int32)
    out4 = jax.block_until_ready(cross_entropy_loss_weighted(x4, t4))
    np.testing.assert_allclose(np.asarray(out4), np.asarray(_reference(x4, t4)),
                               rtol=2e-5, atol=1e-6)

    print("KERNEL_OK")
</pallas_src>

<mosaic_0001>
module attributes {stable_mosaic.version = 11 : i64} {
  func.func @_ce_weighted_kernel(%arg0: i32, %arg1: i32, %arg2: i32, %arg3: memref<1x4x32x128xf32, #tpu.memory_space<vmem>>, %arg4: memref<1x32x128xi8, #tpu.memory_space<vmem>>, %arg5: memref<1x4x128xf32, #tpu.memory_space<vmem>>, %arg6: memref<1x4x128xf32, #tpu.memory_space<vmem>>) attributes {dimension_semantics = [#tpu.dimension_semantics<parallel>, #tpu.dimension_semantics<parallel>, #tpu.dimension_semantics<arbitrary>], iteration_bounds = array<i64: 1, 2, 2>, scalar_prefetch = 0 : i64, scratch_operands = 0 : i64, tpu.core_type = #tpu.core_type<tc>, window_params = [{transform_indices = @transform_0, window_bounds = array<i64: 1, 4, 32, 128>}, {transform_indices = @transform_1, window_bounds = array<i64: 1, 32, 128>}, {transform_indices = @transform_2, window_bounds = array<i64: 1, 4, 128>}, {transform_indices = @transform_3, window_bounds = array<i64: 1, 4, 128>}]} {
    %c0_i32 = arith.constant 0 : i32
    %0 = arith.cmpi eq, %arg2, %c0_i32 : i32
    %1 = arith.extui %0 : i1 to i32
    %c0_i32_0 = arith.constant 0 : i32
    %2 = arith.cmpi ne, %1, %c0_i32_0 : i32
    scf.if %2 {
      %cst_78 = arith.constant 0.000000e+00 : f32
      %143 = vector.broadcast %cst_78 : f32 to vector<1x4x128xf32>
      %c0_79 = arith.constant 0 : index
      %c0_80 = arith.constant 0 : index
      %c0_81 = arith.constant 0 : index
      %144 = vector.load %arg5[%c0_79, %c0_80, %c0_81] : memref<1x4x128xf32, #tpu.memory_space<vmem>>, vector<1x4x128xf32>
      tpu.vector_store %arg5[%c0_79, %c0_80, %c0_81], %143 {strides = array<i32>} : memref<1x4x128xf32, #tpu.memory_space<vmem>>, vector<1x4x128xf32>,
      %cst_82 = arith.constant 0.000000e+00 : f32
      %145 = vector.broadcast %cst_82 : f32 to vector<1x4x128xf32>
      %c0_83 = arith.constant 0 : index
      %c0_84 = arith.constant 0 : index
      %c0_85 = arith.constant 0 : index
      %146 = vector.load %arg6[%c0_83, %c0_84, %c0_85] : memref<1x4x128xf32, #tpu.memory_space<vmem>>, vector<1x4x128xf32>
      tpu.vector_store %arg6[%c0_83, %c0_84, %c0_85], %145 {strides = array<i32>} : memref<1x4x128xf32, #tpu.memory_space<vmem>>, vector<1x4x128xf32>,
    } else {
    }
    %cst = arith.constant 0.000000e+00 : f32
    %3 = vector.broadcast %cst : f32 to vector<1x128xf32>
    %cst_1 = arith.constant 0.000000e+00 : f32
    %4 = vector.broadcast %cst_1 : f32 to vector<1x128xf32>
    %cst_2 = arith.constant 0.000000e+00 : f32
    %5 = vector.broadcast %cst_2 : f32 to vector<1x128xf32>
    %cst_3 = arith.constant 0.000000e+00 : f32
    %6 = vector.broadcast %cst_3 : f32 to vector<1x128xf32>
    %cst_4 = arith.constant 0.000000e+00 : f32
    %7 = vector.broadcast %cst_4 : f32 to vector<1x128xf32>
    %cst_5 = arith.constant 0.000000e+00 : f32
    %8 = vector.broadcast %cst_5 : f32 to vector<1x128xf32>
    %cst_6 = arith.constant 0.000000e+00 : f32
    %9 = vector.broadcast %cst_6 : f32 to vector<1x128xf32>
    %c0_i32_7 = arith.constant 0 : i32
    %c32_i32 = arith.constant 32 : i32
    %10 = arith.muli %c0_i32_7, %c32_i32 : i32
    %11 = tpu.assume_multiple %10, 32 : i32
    %c0 = arith.constant 0 : index
    %12 = arith.index_cast %11 : i32 to index
    %c0_8 = arith.constant 0 : index
    %13 = vector.load %arg4[%c0, %12, %c0_8] : memref<1x32x128xi8, #tpu.memory_space<vmem>>, vector<1x32x128xi8>
    %14 = vector.shape_cast %13 : vector<1x32x128xi8> to vector<32x128xi8>
    %15 = arith.extsi %14 : vector<32x128xi8> to vector<32x128xi32>
    %c0_9 = arith.constant 0 : index
    %c0_10 = arith.constant 0 : index
    %16 = arith.index_cast %11 : i32 to index
    %c0_11 = arith.constant 0 : index
    %17 = vector.load %arg3[%c0_9, %c0_10, %16, %c0_11] : memref<1x4x32x128xf32, #tpu.memory_space<vmem>>, vector<1x1x32x128xf32>
    %18 = vector.shape_cast %17 : vector<1x1x32x128xf32> to vector<32x128xf32>
    %c0_i32_12 = arith.constant 0 : i32
    %19 = vector.broadcast %c0_i32_12 : i32 to vector<32x128xi32>
    %20 = arith.cmpi eq, %15, %19 : vector<32x128xi32>
    %cst_13 = arith.constant 0.000000e+00 : f32
    %21 = vector.broadcast %cst_13 : f32 to vector<32x128xf32>
    %22 = arith.select %20, %18, %21 : vector<32x128xi1>, vector<32x128xf32>
    %23 = arith.extui %20 : vector<32x128xi1> to vector<32x128xi32>
    %24 = arith.sitofp %23 : vector<32x128xi32> to vector<32x128xf32>
    %cst_14 = arith.constant dense<0.000000e+00> : vector<128xf32>
    %25 = vector.multi_reduction <add>, %24, %cst_14 [0] : vector<32x128xf32> to vector<128xf32>
    %26 = vector.shape_cast %25 : vector<128xf32> to vector<1x128xf32>
    %27 = arith.addf %3, %26 : vector<1x128xf32>
    %c0_15 = arith.constant 0 : index
    %c1 = arith.constant 1 : index
    %28 = arith.index_cast %11 : i32 to index
    %c0_16 = arith.constant 0 : index
    %29 = vector.load %arg3[%c0_15, %c1, %28, %c0_16] : memref<1x4x32x128xf32, #tpu.memory_space<vmem>>, vector<1x1x32x128xf32>
    %30 = vector.shape_cast %29 : vector<1x1x32x128xf32> to vector<32x128xf32>
    %31 = arith.maximumf %18, %30 : vector<32x128xf32>
    %c1_i32 = arith.constant 1 : i32
    %32 = vector.broadcast %c1_i32 : i32 to vector<32x128xi32>
    %33 = arith.cmpi eq, %15, %32 : vector<32x128xi32>
    %34 = arith.select %33, %30, %22 : vector<32x128xi1>, vector<32x128xf32>
    %35 = arith.extui %33 : vector<32x128xi1> to vector<32x128xi32>
    %36 = arith.sitofp %35 : vector<32x128xi32> to vector<32x128xf32>
    %cst_17 = arith.constant dense<0.000000e+00> : vector<128xf32>
    %37 = vector.multi_reduction <add>, %36, %cst_17 [0] : vector<32x128xf32> to vector<128xf32>
    %38 = vector.shape_cast %37 : vector<128xf32> to vector<1x128xf32>
    %39 = arith.addf %4, %38 : vector<1x128xf32>
    %c0_18 = arith.constant 0 : index
    %c2 = arith.constant 2 : index
    %40 = arith.index_cast %11 : i32 to index
    %c0_19 = arith.constant 0 : index
    %41 = vector.load %arg3[%c0_18, %c2, %40, %c0_19] : memref<1x4x32x128xf32, #tpu.memory_space<vmem>>, vector<1x1x32x128xf32>
    %42 = vector.shape_cast %41 : vector<1x1x32x128xf32> to vector<32x128xf32>
    %43 = arith.maximumf %31, %42 : vector<32x128xf32>
    %c2_i32 = arith.constant 2 : i32
    %44 = vector.broadcast %c2_i32 : i32 to vector<32x128xi32>
    %45 = arith.cmpi eq, %15, %44 : vector<32x128xi32>
    %46 = arith.select %45, %42, %34 : vector<32x128xi1>, vector<32x128xf32>
    %47 = arith.extui %45 : vector<32x128xi1> to vector<32x128xi32>
    %48 = arith.sitofp %47 : vector<32x128xi32> to vector<32x128xf32>
    %cst_20 = arith.constant dense<0.000000e+00> : vector<128xf32>
    %49 = vector.multi_reduction <add>, %48, %cst_20 [0] : vector<32x128xf32> to vector<128xf32>
    %50 = vector.shape_cast %49 : vector<128xf32> to vector<1x128xf32>
    %51 = arith.addf %5, %50 : vector<1x128xf32>
    %c0_21 = arith.constant 0 : index
    %c3 = arith.constant 3 : index
    %52 = arith.index_cast %11 : i32 to index
    %c0_22 = arith.constant 0 : index
    %53 = vector.load %arg3[%c0_21, %c3, %52, %c0_22] : memref<1x4x32x128xf32, #tpu.memory_space<vmem>>, vector<1x1x32x128xf32>
    %54 = vector.shape_cast %53 : vector<1x1x32x128xf32> to vector<32x128xf32>
    %55 = arith.maximumf %43, %54 : vector<32x128xf32>
    %c3_i32 = arith.constant 3 : i32
    %56 = vector.broadcast %c3_i32 : i32 to vector<32x128xi32>
    %57 = arith.cmpi eq, %15, %56 : vector<32x128xi32>
    %58 = arith.select %57, %54, %46 : vector<32x128xi1>, vector<32x128xf32>
    %59 = arith.subf %18, %55 : vector<32x128xf32>
    %60 = math.exp %59 : vector<32x128xf32>
    %61 = arith.subf %30, %55 : vector<32x128xf32>
    %62 = math.exp %61 : vector<32x128xf32>
    %63 = arith.addf %60, %62 : vector<32x128xf32>
    %64 = arith.subf %42, %55 : vector<32x128xf32>
    %65 = math.exp %64 : vector<32x128xf32>
    %66 = arith.addf %63, %65 : vector<32x128xf32>
    %67 = arith.subf %54, %55 : vector<32x128xf32>
    %68 = math.exp %67 : vector<32x128xf32>
    %69 = arith.addf %66, %68 : vector<32x128xf32>
    %70 = math.log %69 : vector<32x128xf32>
    %71 = arith.addf %55, %70 : vector<32x128xf32>
    %72 = arith.subf %71, %58 : vector<32x128xf32>
    %c0_i32_23 = arith.constant 0 : i32
    %73 = vector.broadcast %c0_i32_23 : i32 to vector<32x128xi32>
    %74 = arith.cmpi eq, %15, %73 : vector<32x128xi32>
    %cst_24 = arith.constant 0.000000e+00 : f32
    %75 = vector.broadcast %cst_24 : f32 to vector<32x128xf32>
    %76 = arith.select %74, %72, %75 : vector<32x128xi1>, vector<32x128xf32>
    %cst_25 = arith.constant dense<0.000000e+00> : vector<128xf32>
    %77 = vector.multi_reduction <add>, %76, %cst_25 [0] : vector<32x128xf32> to vector<128xf32>
    %78 = vector.shape_cast %77 : vector<128xf32> to vector<1x128xf32>
    %79 = arith.addf %6, %78 : vector<1x128xf32>
    %c1_i32_26 = arith.constant 1 : i32
    %80 = vector.broadcast %c1_i32_26 : i32 to vector<32x128xi32>
    %81 = arith.cmpi eq, %15, %80 : vector<32x128xi32>
    %cst_27 = arith.constant 0.000000e+00 : f32
    %82 = vector.broadcast %cst_27 : f32 to vector<32x128xf32>
    %83 = arith.select %81, %72, %82 : vector<32x128xi1>, vector<32x128xf32>
    %cst_28 = arith.constant dense<0.000000e+00> : vector<128xf32>
    %84 = vector.multi_reduction <add>, %83, %cst_28 [0] : vector<32x128xf32> to vector<128xf32>
    %85 = vector.shape_cast %84 : vector<128xf32> to vector<1x128xf32>
    %86 = arith.addf %7, %85 : vector<1x128xf32>
    %c2_i32_29 = arith.constant 2 : i32
    %87 = vector.broadcast %c2_i32_29 : i32 to vector<32x128xi32>
    %88 = arith.cmpi eq, %15, %87 : vector<32x128xi32>
    %cst_30 = arith.constant 0.000000e+00 : f32
    %89 = vector.broadcast %cst_30 : f32 to vector<32x128xf32>
    %90 = arith.select %88, %72, %89 : vector<32x128xi1>, vector<32x128xf32>
    %cst_31 = arith.constant dense<0.000000e+00> : vector<128xf32>
    %91 = vector.multi_reduction <add>, %90, %cst_31 [0] : vector<32x128xf32> to vector<128xf32>
    %92 = vector.shape_cast %91 : vector<128xf32> to vector<1x128xf32>
    %93 = arith.addf %8, %92 : vector<1x128xf32>
    %c3_i32_32 = arith.constant 3 : i32
    %94 = vector.broadcast %c3_i32_32 : i32 to vector<32x128xi32>
    %95 = arith.cmpi eq, %15, %94 : vector<32x128xi32>
    %cst_33 = arith.constant 0.000000e+00 : f32
    %96 = vector.broadcast %cst_33 : f32 to vector<32x128xf32>
    %97 = arith.select %95, %72, %96 : vector<32x128xi1>, vector<32x128xf32>
    %cst_34 = arith.constant dense<0.000000e+00> : vector<128xf32>
    %98 = vector.multi_reduction <add>, %97, %cst_34 [0] : vector<32x128xf32> to vector<128xf32>
    %99 = vector.shape_cast %98 : vector<128xf32> to vector<1x128xf32>
    %100 = arith.addf %9, %99 : vector<1x128xf32>
    %c1_i32_35 = arith.constant 1 : i32
    %c0_36 = arith.constant 0 : index
    %c0_37 = arith.constant 0 : index
    %c0_38 = arith.constant 0 : index
    %101 = vector.load %arg5[%c0_36, %c0_37, %c0_38] : memref<1x4x128xf32, #tpu.memory_space<vmem>>, vector<1x1x128xf32>
    %102 = vector.shape_cast %101 : vector<1x1x128xf32> to vector<1x128xf32>
    %103 = arith.addf %102, %27 : vector<1x128xf32>
    %c0_39 = arith.constant 0 : index
    %c0_40 = arith.constant 0 : index
    %c0_41 = arith.constant 0 : index
    %104 = vector.load %arg5[%c0_39, %c0_40, %c0_41] : memref<1x4x128xf32, #tpu.memory_space<vmem>>, vector<1x1x128xf32>
    %105 = vector.shape_cast %104 : vector<1x1x128xf32> to vector<1x128xf32>
    %106 = vector.shape_cast %103 : vector<1x128xf32> to vector<1x1x128xf32>
    tpu.vector_store %arg5[%c0_39, %c0_40, %c0_41], %106 {strides = array<i32>} : memref<1x4x128xf32, #tpu.memory_space<vmem>>, vector<1x1x128xf32>,
    %c0_42 = arith.constant 0 : index
    %c1_43 = arith.constant 1 : index
    %c0_44 = arith.constant 0 : index
    %107 = vector.load %arg5[%c0_42, %c1_43, %c0_44] : memref<1x4x128xf32, #tpu.memory_space<vmem>>, vector<1x1x128xf32>
    %108 = vector.shape_cast %107 : vector<1x1x128xf32> to vector<1x128xf32>
    %109 = arith.addf %108, %39 : vector<1x128xf32>
    %c0_45 = arith.constant 0 : index
    %c1_46 = arith.constant 1 : index
    %c0_47 = arith.constant 0 : index
    %110 = vector.load %arg5[%c0_45, %c1_46, %c0_47] : memref<1x4x128xf32, #tpu.memory_space<vmem>>, vector<1x1x128xf32>
    %111 = vector.shape_cast %110 : vector<1x1x128xf32> to vector<1x128xf32>
    %112 = vector.shape_cast %109 : vector<1x128xf32> to vector<1x1x128xf32>
    tpu.vector_store %arg5[%c0_45, %c1_46, %c0_47], %112 {strides = array<i32>} : memref<1x4x128xf32, #tpu.memory_space<vmem>>, vector<1x1x128xf32>,
    %c0_48 = arith.constant 0 : index
    %c2_49 = arith.constant 2 : index
    %c0_50 = arith.constant 0 : index
    %113 = vector.load %arg5[%c0_48, %c2_49, %c0_50] : memref<1x4x128xf32, #tpu.memory_space<vmem>>, vector<1x1x128xf32>
    %114 = vector.shape_cast %113 : vector<1x1x128xf32> to vector<1x128xf32>
    %115 = arith.addf %114, %51 : vector<1x128xf32>
    %c0_51 = arith.constant 0 : index
    %c2_52 = arith.constant 2 : index
    %c0_53 = arith.constant 0 : index
    %116 = vector.load %arg5[%c0_51, %c2_52, %c0_53] : memref<1x4x128xf32, #tpu.memory_space<vmem>>, vector<1x1x128xf32>
    %117 = vector.shape_cast %116 : vector<1x1x128xf32> to vector<1x128xf32>
    %118 = vector.shape_cast %115 : vector<1x128xf32> to vector<1x1x128xf32>
    tpu.vector_store %arg5[%c0_51, %c2_52, %c0_53], %118 {strides = array<i32>} : memref<1x4x128xf32, #tpu.memory_space<vmem>>, vector<1x1x128xf32>,
    %c0_54 = arith.constant 0 : index
    %c0_55 = arith.constant 0 : index
    %c0_56 = arith.constant 0 : index
    %119 = vector.load %arg6[%c0_54, %c0_55, %c0_56] : memref<1x4x128xf32, #tpu.memory_space<vmem>>, vector<1x1x128xf32>
    %120 = vector.shape_cast %119 : vector<1x1x128xf32> to vector<1x128xf32>
    %121 = arith.addf %120, %79 : vector<1x128xf32>
    %c0_57 = arith.constant 0 : index
    %c0_58 = arith.constant 0 : index
    %c0_59 = arith.constant 0 : index
    %122 = vector.load %arg6[%c0_57, %c0_58, %c0_59] : memref<1x4x128xf32, #tpu.memory_space<vmem>>, vector<1x1x128xf32>
    %123 = vector.shape_cast %122 : vector<1x1x128xf32> to vector<1x128xf32>
    %124 = vector.shape_cast %121 : vector<1x128xf32> to vector<1x1x128xf32>
    tpu.vector_store %arg6[%c0_57, %c0_58, %c0_59], %124 {strides = array<i32>} : memref<1x4x128xf32, #tpu.memory_space<vmem>>, vector<1x1x128xf32>,
    %c0_60 = arith.constant 0 : index
    %c1_61 = arith.constant 1 : index
    %c0_62 = arith.constant 0 : index
    %125 = vector.load %arg6[%c0_60, %c1_61, %c0_62] : memref<1x4x128xf32, #tpu.memory_space<vmem>>, vector<1x1x128xf32>
    %126 = vector.shape_cast %125 : vector<1x1x128xf32> to vector<1x128xf32>
    %127 = arith.addf %126, %86 : vector<1x128xf32>
    %c0_63 = arith.constant 0 : index
    %c1_64 = arith.constant 1 : index
    %c0_65 = arith.constant 0 : index
    %128 = vector.load %arg6[%c0_63, %c1_64, %c0_65] : memref<1x4x128xf32, #tpu.memory_space<vmem>>, vector<1x1x128xf32>
    %129 = vector.shape_cast %128 : vector<1x1x128xf32> to vector<1x128xf32>
    %130 = vector.shape_cast %127 : vector<1x128xf32> to vector<1x1x128xf32>
    tpu.vector_store %arg6[%c0_63, %c1_64, %c0_65], %130 {strides = array<i32>} : memref<1x4x128xf32, #tpu.memory_space<vmem>>, vector<1x1x128xf32>,
    %c0_66 = arith.constant 0 : index
    %c2_67 = arith.constant 2 : index
    %c0_68 = arith.constant 0 : index
    %131 = vector.load %arg6[%c0_66, %c2_67, %c0_68] : memref<1x4x128xf32, #tpu.memory_space<vmem>>, vector<1x1x128xf32>
    %132 = vector.shape_cast %131 : vector<1x1x128xf32> to vector<1x128xf32>
    %133 = arith.addf %132, %93 : vector<1x128xf32>
    %c0_69 = arith.constant 0 : index
    %c2_70 = arith.constant 2 : index
    %c0_71 = arith.constant 0 : index
    %134 = vector.load %arg6[%c0_69, %c2_70, %c0_71] : memref<1x4x128xf32, #tpu.memory_space<vmem>>, vector<1x1x128xf32>
    %135 = vector.shape_cast %134 : vector<1x1x128xf32> to vector<1x128xf32>
    %136 = vector.shape_cast %133 : vector<1x128xf32> to vector<1x1x128xf32>
    tpu.vector_store %arg6[%c0_69, %c2_70, %c0_71], %136 {strides = array<i32>} : memref<1x4x128xf32, #tpu.memory_space<vmem>>, vector<1x1x128xf32>,
    %c0_72 = arith.constant 0 : index
    %c3_73 = arith.constant 3 : index
    %c0_74 = arith.constant 0 : index
    %137 = vector.load %arg6[%c0_72, %c3_73, %c0_74] : memref<1x4x128xf32, #tpu.memory_space<vmem>>, vector<1x1x128xf32>
    %138 = vector.shape_cast %137 : vector<1x1x128xf32> to vector<1x128xf32>
    %139 = arith.addf %138, %100 : vector<1x128xf32>
    %c0_75 = arith.constant 0 : index
    %c3_76 = arith.constant 3 : index
    %c0_77 = arith.constant 0 : index
    %140 = vector.load %arg6[%c0_75, %c3_76, %c0_77] : memref<1x4x128xf32, #tpu.memory_space<vmem>>, vector<1x1x128xf32>
    %141 = vector.shape_cast %140 : vector<1x1x128xf32> to vector<1x128xf32>
    %142 = vector.shape_cast %139 : vector<1x128xf32> to vector<1x1x128xf32>
    tpu.vector_store %arg6[%c0_75, %c3_76, %c0_77], %142 {strides = array<i32>} : memref<1x4x128xf32, #tpu.memory_space<vmem>>, vector<1x1x128xf32>,
    return
  }
  func.func @transform_0(%arg0: i32, %arg1: i32, %arg2: i32) -> (i32, i32, i32, i32) {
    %c2_i32 = arith.constant 2 : i32
    %0 = arith.muli %arg0, %c2_i32 : i32
    %1 = arith.addi %0, %arg2 : i32
    %c1_i32 = arith.constant 1 : i32
    %2 = arith.minsi %1, %c1_i32 : i32
    %c0_i32 = arith.constant 0 : i32
    %c0_i32_0 = arith.constant 0 : i32
    %c0_i32_1 = arith.constant 0 : i32
    return %arg1, %c0_i32, %2, %c0_i32_0 : i32, i32, i32, i32
  }
  func.func @transform_1(%arg0: i32, %arg1: i32, %arg2: i32) -> (i32, i32, i32) {
    %c2_i32 = arith.constant 2 : i32
    %0 = arith.muli %arg0, %c2_i32 : i32
    %1 = arith.addi %0, %arg2 : i32
    %c0_i32 = arith.constant 0 : i32
    %c0_i32_0 = arith.constant 0 : i32
    return %arg1, %1, %c0_i32 : i32, i32, i32
  }
  func.func @transform_2(%arg0: i32, %arg1: i32, %arg2: i32) -> (i32, i32, i32) {
    %c2_i32 = arith.constant 2 : i32
    %0 = arith.muli %arg0, %c2_i32 : i32
    %1 = arith.addi %0, %arg1 : i32
    %c0_i32 = arith.constant 0 : i32
    %c0_i32_0 = arith.constant 0 : i32
    %c0_i32_1 = arith.constant 0 : i32
    return %1, %c0_i32, %c0_i32_0 : i32, i32, i32
  }
  func.func @transform_3(%arg0: i32, %arg1: i32, %arg2: i32) -> (i32, i32, i32) {
    %c2_i32 = arith.constant 2 : i32
    %0 = arith.muli %arg0, %c2_i32 : i32
    %1 = arith.addi %0, %arg1 : i32
    %c0_i32 = arith.constant 0 : i32
    %c0_i32_0 = arith.constant 0 : i32
    %c0_i32_1 = arith.constant 0 : i32
    return %1, %c0_i32, %c0_i32_0 : i32, i32, i32
  }
}

</mosaic_0001>

<bundles_post_ra>
// kernel: tpu_custom_call.1
= control target key start
LH: loop header
LB: loop body
LE: loop exit
PB: predicated region body
PF: predicated region fallthrough
CT: control target
= control target key end

     0   :  { %s1872_s0 = inlined_call_operand.hbm [shape: f32[2,4,40,128], index: 0, kind: input, shape index: {}]   ;;  %s1873_s1 = inlined_call_operand.hbm [shape: s8[2,64,128], index: 1, kind: input, shape index: {}]   ;;  %s1874_s2 = inlined_call_operand.hbm [shape: f32[2,4,128], index: 2, kind: output, shape index: {0}]   ;;  %s1875_s3 = inlined_call_operand.hbm [shape: f32[2,4,128], index: 3, kind: output, shape index: {1}]  }
   0x1   :  { %1891 = sst [smem:[#allocation27_spill]] %s1874_s2 }
   0x2   :  { %1892 = sst [smem:[#allocation28_spill]] %s1875_s3 }
   0x3   :  { %9 = vsyncpa [#allocation3], 0 }
   0x4   :  { %11 = vsyncpa [#allocation3 + $0x1], 0 }
   0x5   :  { %12 = vsyncpa [#allocation6], 0 }
   0x6   :  { %14 = vsyncpa [#allocation6 + $0x1], 0 }
   0x7   :  { %15 = vsyncpa [#allocation4], 0 }
   0x8   :  { %17 = vsyncpa [#allocation4 + $0x1], 0 }
   0x9   :  { %18 = vsyncpa [#allocation9], 0 }
   0xa   :  { %20 = vsyncpa [#allocation9 + $0x1], 0  ;;  %s1282_s12 = smov 0   ;;  %s1284_s13 = smov 0  }
   0xb   :  { %s1286_s14 = smov 0   ;;  %s1288_s15 = smov 0  }
   0xc   :  { %s1290_s16 = smov 0   ;;  %s1292_s17 = smov 0  }
   0xd   :  { %s1294_s18 = smov 0   ;;  %s1296_s19 = smov 0  }
   0xe   :  { %s1298_s20 = smov 0   ;;  %s1300_s21 = smov 0  }
   0xf   :  { %s1302_s22 = smov 0   ;;  %s1304_s23 = smov 0  }
  0x10   :  { %s1306_s24 = smov 0   ;;  %s1308_s25 = smov 0  }
  0x11 LB: > { %1893 = sst [smem:[#allocation16_spill]] %s1198_s12  ;;  %s1876_s26 = sadd.s32 4294967295, %s1250_s25   ;;  %s1250_s25 = sphi %s1308_s25, %s26_s25   ;;  %s1246_s24 = sphi %s1306_s24, %s1941_s24   ;;  %s1242_s23 = sphi %s1304_s23, %s1940_s23   ;;  %s1238_s22 = sphi %s1302_s22, %s1939_s22   ;;  %s1234_s21 = sphi %s1300_s21, %s1938_s21   ;;  %s1230_s20 = sphi %s1298_s20, %s1928_s20   ;;  %s1226_s19 = sphi %s1296_s19, %s1937_s19   ;;  %s1222_s18 = sphi %s1294_s18, %s1936_s18   ;;  %s1218_s17 = sphi %s1292_s17, %s1935_s17   ;;  %s1214_s16 = sphi %s1290_s16, %s1934_s16   ;;  %s1210_s15 = sphi %s1288_s15, %s1933_s15   ;;  %s1206_s14 = sphi %s1286_s14, %s1925_s14   ;;  %s1202_s13 = sphi %s1284_s13, %s1932_s13   ;;  %s1198_s12 = sphi %s1282_s12, %s1931_s12  }
  0x12   : > { %1894 = sst [smem:[#allocation17_spill]] %s1206_s14  ;;  %s38_s28 = sadd.s32 1, %s1242_s23 }
  0x13   : > { %1895 = sst [smem:[#allocation18_spill]] %s1230_s20  ;;  %s41_s29 = sadd.s32 1, %s1246_s24 }
  0x14   : > { %1896 = sst [smem:[#allocation19_spill]] %s1238_s22  ;;  %p39_p0 = scmp.ge.s32.totalorder %s38_s28, 2 }
  0x15   : > { %p51_p1 = scmp.lt.s32.totalorder %s1242_s23, 1  ;;  %s62_s30 = sadd.s32 1, %s1230_s20 }
  0x16   : > { %p69_p2 = scmp.ne.s32.totalorder %s1230_s20, %s1226_s19  ;;  %s1943_s28 = smov (%p39_p0, %s38_s28), 0 }
  0x17   : > { %1897 = sst [smem:[#allocation20_spill]] %s1943_s28  ;;  %s1945_s29 = smov (!%p39_p0, %s41_s29), %s1246_s24 }
  0x18   : > { %s1364_s4 = scalar_select %p51_p1, %s1242_s23, 1 }
  0x19   : > { %p43_p3 = scmp.ge.s32.totalorder %s1945_s29, 2  ;;  %p55_p4 = scmp.lt.s32.totalorder %s1943_s28, 1 }
  0x1a   : > { %p70_p5 = scmp.eq.s32.totalorder %s1250_s25, 0  ;;  %p75_p6 = scmp.ne.s32.totalorder %s1226_s19, %s1222_s18 }
  0x1b   : > { %s1947_s29 = smov (%p43_p3, %s1945_s29), 0  ;;  %p1384_p8 = scmp.eq.s32.totalorder %s1876_s26, 0 }
  0x1c   : > { %1898 = sst [smem:[#allocation21_spill]] %s1947_s29  ;;  %s57_s6 = ssub.s32 %s1246_s24, %s1947_s29 }
  0x1d   : > { %s56_s5 = scalar_select %p55_p4, %s1943_s28, 1 }
  0x1e   : > { %p1377_p7 = por %p70_p5, %p69_p2  ;;  %s90_s11 = ssub.s32 %s1242_s23, %s1943_s28 }
  0x1f   : > { %s58_s8 = ssub.s32 %s1364_s4, %s56_s5  ;;  %p1392_p10 = por %p1384_p8, %p75_p6 }
  0x20   : > { %s59_s10 = sor.u32 %s58_s8, %s57_s6  ;;  %s91_s5 = sor.u32 %s90_s11, %s57_s6 }
  0x21   : > { %p60_p9 = scmp.eq.s32.totalorder %s59_s10, 0  ;;  %s94_s27 = sadd.s32 1, %s1218_s17 }
  0x22   : > { %s1901_s18 = scalar_select %p1392_p10, 1, 0 }
  0x23   : > { %s1398_s26 = scalar_select %p60_p9, %s1230_s20, %s62_s30  }
  0x24   : > { %p92_p11 = scmp.eq.s32.totalorder %s91_s5, 0  ;;  %p101_p12 = scmp.ne.s32.totalorder %s1218_s17, %s1214_s16 }
  0x25   : > { %1902 = sst [smem:[#allocation22_spill]] %s1398_s26  ;;  %p107_p13 = scmp.ne.s32.totalorder %s1214_s16, %s1210_s15 }
  0x26   : > { %p122_p0 = scmp.eq.s32.totalorder %s57_s6, 0  ;;  %p1409_p1 = por %p101_p12, %p70_p5 }
  0x27   : > { %s1405_s8 = scalar_select %p92_p11, %s1218_s17, %s94_s27  }
  0x28   : > { %p1415_p2 = por %p107_p13, %p1384_p8  ;;  %s124_s11 = sadd.s32 1, %s1206_s14 }
  0x29   : > { %1903 = sst [smem:[#allocation23_spill]] %s1405_s8  ;;  %p134_p3 = scmp.ne.s32.totalorder %s1206_s14, %s1202_s13 }
  0x2a   : > { %s1905_s29 = scalar_select %p1415_p2, 1, 0 }
  0x2b   : > { %s1423_s30 = scalar_select %p122_p0, %s1206_s14, %s124_s11  }
  0x2c   : > { %s1907_s5 = sadd.s32 4294967295, %s1250_s25   ;;  %p140_p6 = scmp.ne.s32.totalorder %s1202_s13, %s1198_s12 }
  0x2d   : > { %1906 = sst [smem:[#allocation24_spill]] %s1423_s30  ;;  %p135_p4 = scmp.eq.s32.totalorder %s1907_s5, 3 }
  0x2e   : > { %s1908_s15 = sadd.s32 4294967294, %s1250_s25   ;;  %p813_p8 = scmp.ge.s32.totalorder %s1250_s25, 4 }
  0x2f   : > { %p141_p9 = scmp.eq.s32.totalorder %s1908_s15, 3  ;;  %p1431_p11 = por %p135_p4, %p134_p3 }
  0x30   : > { %187 = sbr.rel (%p813_p8) target bundleno = 106 (0x6a), region = 16 }
  0x31   : > { %s1909_s27 = scalar_select %p1431_p11, 1, 0 }
  0x32   : > { %p1435_p5 = por %p141_p9, %p140_p6 }
  0x33   : > { %1910 = sst [smem:[#allocation25_spill]] %s1909_s27 }
  0x34   : > { %s1911_s6 = scalar_select %p1435_p5, 1, 0 }
  0x36   : > { %1912 = sst [smem:[#allocation26_spill]] %s1911_s6 }
  0x37   : > { %190 = sbr.rel (!%p1377_p7) target bundleno = 80 (0x50), region = 20 }
  0x3e   : > { %s191_s9 = sand.u32 1, %s1230_s20   ;;  %s815_s11 = sshll.u32 %s1364_s4, 2 }
  0x3f   : > { %s814_s5 = sshll.u32 %s191_s9, 7  ;;  %s201_s15 = ssub.s32 5, %s815_s11 }
  0x40   : > { %p202_p12 = scmp.lt.s32.totalorder %s201_s15, 4  ;;  %s192_s8 = scalar_lea.sflag [#allocation3], %s191_s9 }
  0x41   : > { %s195_s30 = scalar_lea.vmem [#allocation2], %s814_s5 }
  0x42   : > { %s1949_s15 = smov (!%p202_p12, %s201_s15), 4 }
  0x43   : > { %s1444_s28 = sshll.u32 %s1949_s15, 9 }
  0x44   : > { %s206_s26 = ssub.s32 2048, %s1444_s28 }
  0x45   : > { %207 = vsyncadd %s192_s8, %s206_s26  ;;  %p817_p13 = scmp.ne.s32.totalorder %s1444_s28, 0  ;;  %s865_s7 = smul.u32 20, %s1246_s24 }
  0x46   : > { %s219_s14 = sld [smem:[#allocation0]]   ;;  %s227_s6 = sshll.u32 %s195_s30, 4  ;;  %s228_s6 = int_to_ptr.vmem [resolvable:$true] %s227_s6 }
  0x47   : > { %s210_s12 = sadd.s32 %s865_s7, %s815_s11  ;;  %s1252_s27 = smov 640  }
  0x48   : > { %s818_s4 = sshll.u32 %s210_s12, 7  ;;  %234 = sst [smem:[#allocation11]] %s1252_s27 }
  0x49   : > { %s212_s2 = scalar_lea.hbm %s1872_s0, %s818_s4  ;;  %238 = sst [smem:[#allocation11 + $0x2]] %s1949_s15 }
  0x4a   : > { %s1253_s9 = smov 512   ;;  %s1254_s5 = smov 128  }
  0x4b   : > { %236 = sst [smem:[#allocation11 + $0x1]] %s1253_s9  ;;  %s1255_s30 = smov 8  }
  0x4c   : > { %s821_s26 = sshll.u32 %s219_s14, 26  ;;  %240 = sst [smem:[#allocation11 + $0x3]] %s1254_s5 }
  0x4d   : > { %s822_s22 = sadd.s32 134217728, %s821_s26  ;;  %242 = sst [smem:[#allocation11 + $0x4]] %s1254_s5 }
  0x4e   : > { %244 = sst [smem:[#allocation11 + $0x5]] %s1255_s30  ;;  %s1256_s11 = smov [#allocation10]  }
  0x4f   : > { %246 = dma.general (%p817_p13), %s212_s2, %s1444_s28, %s228_s6, %s192_s8, %s1256_s11, [#allocation11], %s822_s22, 0  }
  0x50 PF: > { %s250_s3 = sand.u32 1, %s1218_s17   ;;  %s825_s12 = sshll.u32 %s1246_s24, 1 }
  0x51   : > { %s824_s20 = sshll.u32 %s250_s3, 3  ;;  %s261_s27 = sadd.s32 %s1242_s23, %s825_s12 }
  0x52   : > { %s826_s15 = sshll.u32 %s261_s27, 7  ;;  %s254_s14 = scalar_lea.vmem [#allocation5], %s824_s20 }
  0x53   : > { %s265_s7 = sshll.u32 %s254_s14, 4  ;;  %s1461_s26 = scalar_lea.hbm %s1873_s1, %s826_s15  ;;  %s266_s7 = int_to_ptr.vmem [resolvable:$true] %s265_s7 }
  0x54   : > { %s251_s2 = scalar_lea.sflag [#allocation6], %s250_s3  ;;  %s1040_s22 = scalar_lea.hbm %s1461_s26, 128 }
  0x55   : > { %p1041_p7 = scmp.ne.s32.totalorder %s1461_s26, %s1040_s22  ;;  %s1044_s6 = scalar_lea.hbm %s1873_s1, 512 }
  0x56   : > { %p1045_p4 = scmp.lt.u32.totalorder %s1461_s26, %s1873_s1  ;;  %p1046_p6 = scmp.lt.u32.totalorder %s1044_s6, %s1040_s22 }
  0x57   : > { %p1042_p0 = pnand %p1041_p7, %p1409_p1  ;;  %p1048_p8 = scmp.lt.u32.totalorder %s1040_s22, %s1461_s26 }
  0x58   : > { %p1047_p9 = por %p1046_p6, %p1045_p4 }
  0x59   : > { %p1043_p3 = pneg %p1042_p0 }
  0x5a   : > { %p1049_p12 = por %p1048_p8, %p1047_p9 }
  0x5c   : > { %p1050_p13 = pnand %p1049_p12, %p1043_p3 }
  0x5e   : > { %1053 = shalt.err (!%p1050_p13)
}
  0x5f   : > { %s1054_s11 = scalar_lea.vmem %s266_s7, 128  ;;  %s1257_s3 = smov [#allocation5]  }
  0x60   : > { %p1055_p5 = scmp.ne.s32.totalorder %s266_s7, %s1054_s11  ;;  %s1058_s12 = sshll.u32 %s1257_s3, 4  ;;  %s1059_s12 = int_to_ptr.vmem [resolvable:$false] %s1058_s12 }
  0x61   : > { %s1060_s20 = scalar_lea.vmem %s1059_s12, 256  ;;  %p1061_p11 = scmp.lt.s32.totalorder %s266_s7, %s1059_s12 }
  0x62   : > { %p1056_p7 = pnand %p1055_p5, %p1409_p1  ;;  %p1062_p2 = scmp.lt.s32.totalorder %s1060_s20, %s1054_s11 }
  0x64   : > { %p1057_p0 = pneg %p1056_p7  ;;  %p1063_p10 = por %p1062_p2, %p1061_p11 }
  0x66   : > { %p1064_p4 = pnand %p1063_p10, %p1057_p0 }
  0x68   : > { %1067 = shalt.err (!%p1064_p4)
}
  0x69   : > { %866 = dma.hbm_to_vmem [thread:$0]  (%p1409_p1), %s1461_s26, 128, %s266_s7, %s251_s2  }
  0x6a PF: > { %p827_p3 = scmp.ge.s32.totalorder %s1250_s25, 1  ;;  %p270_p6 = scmp.lt.s32.totalorder %s1250_s25, 5 }
  0x6c   : > { %p271_p5 = pnand %p827_p3, %p270_p6 }
  0x6d   : > { %s276_s27 = sand.u32 (!%p271_p5), 1, %s1226_s19   ;;  %p1913_p10 = scmp.ne.s32.totalorder (!%p271_p5), %s1901_s18, 0 }
  0x6e   : > { %274 = sbr.rel (%p271_p5) target bundleno = 246 (0xf6), region = 28  ;;  %s828_s15 = sshll.u32 (!%p271_p5), %s276_s27, 7 }
  0x6f   : > { %s277_s14 = scalar_lea.sflag (!%p271_p5), [#allocation3], %s276_s27  ;;  %s1483_s4 = scalar_lea.vmem (!%p271_p5), [#allocation2], %s828_s15 }
  0x75   : > { %1181 = dma.done.wait (%p1913_p10), %s277_s14, 2048  }
  0x76   : > { %1183 = vsyncadd (%p1913_p10), %s277_s14, 4294965248  ;;  %s285_s10 = sand.u32 1, %s1214_s16   ;;  %p1914_p1 = scmp.ne.s32.totalorder %s1905_s29, 0 }
  0x77   : > { %s829_s7 = sshll.u32 %s285_s10, 3  ;;  %s286_s9 = scalar_lea.sflag [#allocation6], %s285_s10 }
  0x78   : > { %s289_s26 = scalar_lea.vmem [#allocation5], %s829_s7 }
  0x79   : > { %1185 = dma.done.wait (%p1914_p1), %s286_s9, 128  }
  0x7a   : > { %1187 = vsyncadd (%p1914_p1), %s286_s9, 4294967168  ;;  %s1495_s2 = sand.u32 1, %s1202_s13   ;;  %p832_p2 = scmp.ne.s32.totalorder %s1234_s21, 0 }
  0x7b   : > { %s830_s22 = sshll.u32 %s1495_s2, 2  ;;  %v1258_v0 = vmov (!%p832_p2), 0.0  }
  0x7c   : > { %s1498_s28 = scalar_lea.vmem [#allocation7], %s830_s22  ;;  %s1500_s18 = scalar_lea.vmem [#allocation8], %s830_s22 }
  0x7d   : > { %340 = sbr.rel (%p832_p2) target bundleno = 132 (0x84), region = 40  ;;  %341 = vst [vmem:[%s1498_s28] sm:$0xf] (!%p832_p2), %v1258_v0  ;;  %342 = vst [vmem:[%s1500_s18] sm:$0xf] (!%p832_p2), %v1258_v0 }
  0x84 PF: > { %v343_v1 = vld [vmem:[%s289_s26] sm:$0xff]  ;;  %v1529_v10 = vld [vmem:[%s1483_s4 + $0x10] sm:$0xff]  ;;  %v1259_v11 = vmov 0.0   ;;  %v1541_v16 = vld [vmem:[%s1483_s4 + $0x18] sm:$0xff]  ;;  %s1915_s21 = sld [smem:[#allocation19_spill]]  ;;  %s642_s8 = sshll.u32 %s1498_s28, 4  ;;  %s1667_s8 = int_to_ptr.vmem [resolvable:$true] %s642_s8 }
  0x85   : > { %v1505_v2 = vunpack.c.0.s8 %v343_v1  ;;  %v1507_v3 = vunpack.c.1.s8 %v343_v1  ;;  %v1509_v4 = vunpack.c.2.s8 %v343_v1  ;;  %v1511_v5 = vunpack.c.3.s8 %v343_v1  ;;  %v1514_v6 = vld [vmem:[%s1483_s4] sm:$0xff]  ;;  %v1517_v7 = vld [vmem:[%s1483_s4 + $0x8] sm:$0xff]  ;;  %v1538_v15 = vld [vmem:[%s1483_s4 + $0x30] sm:$0xff]  ;;  %s1916_s6 = sld [smem:[#allocation25_spill]]  ;;  %s1917_s11 = sld [smem:[#allocation27_spill]] }
  0x86   : > { %v1523_v8 = vld [vmem:[%s1483_s4 + $0x20] sm:$0xff]  ;;  %v1526_v9 = vld [vmem:[%s1483_s4 + $0x28] sm:$0xff]  ;;  %v1545_v18 = vld [vmem:[%s1483_s4 + $0x38] sm:$0xff]  ;;  %v386_v23 = vmax.f32 %v1529_v10, %v1538_v15  ;;  %s622_s12 = scalar_lea.sflag [#allocation4], %s1495_s2  ;;  %s1068_s20 = scalar_lea.vmem %s1667_s8, 64 }
  0x87   : > { %vm352_vm0 = vcmp.eq.s32.totalorder %v1505_v2, 0  ;;  %vm353_vm1 = vcmp.eq.s32.totalorder %v1507_v3, 0  ;;  %vm354_vm2 = vcmp.eq.s32.totalorder %v1509_v4, 0  ;;  %vm355_vm3 = vcmp.eq.s32.totalorder %v1511_v5, 0  ;;  %v1565_v27 = vld [vmem:[%s1483_s4 + $0x40] sm:$0xff]  ;;  %v1571_v31 = vld [vmem:[%s1483_s4 + $0x48] sm:$0xff]  ;;  %p1069_p11 = scmp.ne.s32.totalorder %s1667_s8, %s1068_s20 }
  0x88   : > { %v833_v12 = vsel %vm352_vm0, 1.0, %v1259_v11  ;;  %v834_v13 = vsel %vm353_vm1, 1.0, %v1259_v11  ;;  %v835_v14 = vsel %vm354_vm2, 1.0, %v1259_v11  ;;  %v836_v19 = vsel %vm355_vm3, 1.0, %v1259_v11  ;;  %v1574_v32 = vld [vmem:[%s1483_s4 + $0x50] sm:$0xff]  ;;  %v1577_v33 = vld [vmem:[%s1483_s4 + $0x58] sm:$0xff] }
  0x89   : > { %v368_v17 = vadd.f32 %v834_v13, %v833_v12  ;;  %v384_v20 = vmax.f32 %v1514_v6, %v1523_v8  ;;  %v385_v21 = vmax.f32 %v1517_v7, %v1526_v9  ;;  %vm388_vm4 = vcmp.eq.s32.totalorder %v1505_v2, 1  ;;  %v1589_v43 = vld [vmem:[%s1483_s4 + $0x60] sm:$0xff]  ;;  %v1592_v44 = vld [vmem:[%s1483_s4 + $0x68] sm:$0xff]  ;;  %v1595_v45 = vld [vmem:[%s1483_s4 + $0x70] sm:$0xff]  ;;  %s1260_s27 = smov [#allocation7]  }
  0x8a   : > { %vm389_vm5 = vcmp.eq.s32.totalorder %v1507_v3, 1  ;;  %v387_v24 = vmax.f32 %v1541_v16, %v1545_v18  ;;  %vm390_vm6 = vcmp.eq.s32.totalorder %v1509_v4, 1  ;;  %v841_v25 = vsel %vm388_vm4, 1.0, %v1259_v11  ;;  %v1604_v49 = vld [vmem:[%s1483_s4 + $0x78] sm:$0xff]  ;;  %v600_v0 = vld [vmem:[%s1498_s28] sm:$0x1] }
  0x8b   : > { %v369_v22 = vadd.f32 %v835_v14, %v368_v17  ;;  %v842_v26 = vsel %vm389_vm5, 1.0, %v1259_v11  ;;  %vm391_vm7 = vcmp.eq.s32.totalorder %v1511_v5, 1  ;;  %v843_v29 = vsel %vm390_vm6, 1.0, %v1259_v11  ;;  %s859_s29 = sshll.u32 %s1915_s21, 6  ;;  %p1918_p9 = scmp.ne.s32.totalorder %s1916_s6, 0 }
  0x8c   : > { %v404_v30 = vadd.f32 %v842_v26, %v841_v25  ;;  %v844_v34 = vsel %vm391_vm7, 1.0, %v1259_v11  ;;  %v420_v37 = vmax.f32 %v384_v20, %v1565_v27  ;;  %v421_v38 = vmax.f32 %v385_v21, %v1571_v31  ;;  %s1665_s3 = scalar_lea.hbm %s1917_s11, %s859_s29  ;;  %s1072_s15 = sshll.u32 %s1260_s27, 4  ;;  %s1073_s15 = int_to_ptr.vmem [resolvable:$false] %s1072_s15 }
  0x8d   : > { %v370_v28 = vadd.f32 %v836_v19, %v369_v22  ;;  %v422_v39 = vmax.f32 %v386_v23, %v1574_v32  ;;  %v423_v40 = vmax.f32 %v387_v24, %v1577_v33  ;;  %vm424_vm8 = vcmp.eq.s32.totalorder %v1505_v2, 2  ;;  %p1070_p8 = pnand %p1069_p11, %p1918_p9  ;;  %s1074_s14 = scalar_lea.vmem %s1073_s15, 128 }
  0x8e   : > { %v405_v36 = vadd.f32 %v843_v29, %v404_v30  ;;  %vm425_vm9 = vcmp.eq.s32.totalorder %v1507_v3, 2  ;;  %vm426_vm10 = vcmp.eq.s32.totalorder %v1509_v4, 2  ;;  %v849_v46 = vsel %vm424_vm8, 1.0, %v1259_v11  ;;  %v603_v29 = vld [vmem:[%s1498_s28 + $0x1] sm:$0x1]  ;;  %p1075_p13 = scmp.lt.s32.totalorder %s1667_s8, %s1073_s15  ;;  %p1076_p7 = scmp.lt.s32.totalorder %s1074_s14, %s1068_s20 }
  0x8f   : > { %v371_v35 = vrot.slane %v370_v28, 4  ;;  %v850_v47 = vsel %vm425_vm9, 1.0, %v1259_v11  ;;  %v851_v48 = vsel %vm426_vm10, 1.0, %v1259_v11  ;;  %vm427_vm11 = vcmp.eq.s32.totalorder %v1511_v5, 2  ;;  %p1071_p12 = pneg %p1070_p8 }
  0x90   : > { %v406_v42 = vadd.f32 %v844_v34, %v405_v36  ;;  %v440_v52 = vadd.f32 %v850_v47, %v849_v46  ;;  %v852_v53 = vsel %vm427_vm11, 1.0, %v1259_v11  ;;  %v1610_v54 = vmax.f32 %v420_v37, %v1589_v43  ;;  %p1077_p0 = por %p1076_p7, %p1075_p13 }
  0x91   : > { %v372_v41 = vadd.f32 %v371_v35, %v370_v28  ;;  %v1613_v55 = vmax.f32 %v421_v38, %v1592_v44  ;;  %v1616_v56 = vmax.f32 %v422_v39, %v1595_v45  ;;  %v1619_v60 = vmax.f32 %v423_v40, %v1604_v49 }
  0x92   : > { %v407_v51 = vrot.slane %v406_v42, 4  ;;  %v441_v59 = vadd.f32 %v851_v48, %v440_v52  ;;  %v468_v1 = vsub.f32 %v1514_v6, %v1610_v54  ;;  %v480_v23 = vsub.f32 %v1523_v8, %v1610_v54  ;;  %p1078_p4 = pnand %p1077_p0, %p1071_p12 }
  0x93   : > { %v373_v50 = vrot.slane %v372_v41, 2  ;;  %v469_v11 = vsub.f32 %v1517_v7, %v1613_v55  ;;  %v470_v12 = vsub.f32 %v1529_v10, %v1616_v56  ;;  %v471_v19 = vsub.f32 %v1541_v16, %v1619_v60 }
  0x94   : > { %v408_v58 = vadd.f32 %v407_v51, %v406_v42  ;;  %v442_v63 = vadd.f32 %v852_v53, %v441_v59  ;;  %v472_v20 = vmul.f32 1.442695, %v468_v1  ;;  %v481_v30 = vsub.f32 %v1526_v9, %v1613_v55 }
  0x95   : > { %v374_v57 = vadd.f32 %v373_v50, %v372_v41  ;;  %v474_v21 = vmul.f32 1.442695, %v469_v11  ;;  %v476_v22 = vmul.f32 1.442695, %v470_v12  ;;  %v478_v28 = vmul.f32 1.442695, %v471_v19 }
  0x96   : > { %v409_v62 = vrot.slane %v408_v58, 2  ;;  %v443_v17 = vrot.slane %v442_v63, 4  ;;  %1000 = vpow2.f32 %v472_v20  ;;  %v482_v34 = vsub.f32 %v1538_v15, %v1616_v56 }
  0x97   : > { %v375_v61 = vrot.slane %v374_v57, 1  ;;  %v483_v35 = vsub.f32 %v1545_v18, %v1619_v60  ;;  %1002 = vpow2.f32 %v474_v21  ;;  %v484_v38 = vmul.f32 1.442695, %v480_v23 }
  0x98   : > { %v410_v14 = vadd.f32 %v409_v62, %v408_v58  ;;  %v444_v26 = vadd.f32 %v443_v17, %v442_v63  ;;  %1004 = vpow2.f32 %v476_v22  ;;  %v486_v39 = vmul.f32 1.442695, %v481_v30  ;;  %v606_v58 = vld [vmem:[%s1498_s28 + $0x2] sm:$0x1] }
  0x99   : > { %v376_v13 = vadd.f32 %v375_v61, %v374_v57  ;;  %v488_v40 = vmul.f32 1.442695, %v482_v34  ;;  %v490_v41 = vmul.f32 1.442695, %v483_v35  ;;  %1006 = vpow2.f32 %v478_v28 }
  0x9a   : > { %v411_v25 = vrot.slane %v410_v14, 1  ;;  %v445_v37 = vrot.slane %v444_v26, 2  ;;  %v496_v47 = vsub.f32 %v1565_v27, %v1610_v54  ;;  %1008 = vpow2.f32 %v484_v38 }
  0x9b   : > { %v601_v24 = vadd.f32 %v600_v0, %v376_v13  ;;  %v497_v48 = vsub.f32 %v1571_v31, %v1613_v55  ;;  %v498_v50 = vsub.f32 %v1574_v32, %v1616_v56  ;;  %v499_v51 = vsub.f32 %v1577_v33, %v1619_v60 }
  0x9c   : > { %v412_v36 = vadd.f32 %v411_v25, %v410_v14  ;;  %v446_v46 = vadd.f32 %v445_v37, %v444_v26  ;;  %1010 = vpow2.f32 %v486_v39  ;;  %v500_v53 = vmul.f32 1.442695, %v496_v47 }
  0x9d   : > { %602 = vst [vmem:[%s1498_s28] sm:$0x1] %v601_v24  ;;  %v512_v57 = vsub.f32 %v1589_v43, %v1610_v54  ;;  %1012 = vpow2.f32 %v488_v40  ;;  %v502_v59 = vmul.f32 1.442695, %v497_v48  ;;  %v504_v61 = vmul.f32 1.442695, %v498_v50 }
  0x9e   : > { %v604_v42 = vadd.f32 %v603_v29, %v412_v36  ;;  %v447_v52 = vrot.slane %v446_v46, 1  ;;  %v506_v62 = vmul.f32 1.442695, %v499_v51  ;;  %1014 = vpow2.f32 %v490_v41 }
  0x9f   : > { %v513_v0 = vsub.f32 %v1592_v44, %v1613_v55  ;;  %v514_v1 = vsub.f32 %v1595_v45, %v1616_v56  ;;  %1016 = vpow2.f32 %v500_v53  ;;  %v515_v11 = vsub.f32 %v1604_v49, %v1619_v60 }
  0xa0   : > { %605 = vst [vmem:[%s1498_s28 + $0x1] sm:$0x1] %v604_v42  ;;  %v448_v63 = vadd.f32 %v447_v52, %v446_v46  ;;  %v516_v12 = vmul.f32 1.442695, %v512_v57  ;;  %1018 = vpow2.f32 %v502_v59  ;;  %v1001_v17 = vpop.eup %1000 }
  0xa1   : > { %v518_v13 = vmul.f32 1.442695, %v513_v0  ;;  %1020 = vpow2.f32 %v504_v61  ;;  %v520_v19 = vmul.f32 1.442695, %v514_v1  ;;  %v1003_v20 = vpop.eup %1002  ;;  %v522_v21 = vmul.f32 1.442695, %v515_v11 }
  0xa2   : > { %v607_v14 = vadd.f32 %v606_v58, %v448_v63  ;;  %1022 = vpow2.f32 %v506_v62  ;;  %v1005_v22 = vpop.eup %1004 }
  0xa3   : > { %1024 = vpow2.f32 %v516_v12 }
  0xa4   : > { %608 = vst [vmem:[%s1498_s28 + $0x2] sm:$0x1] %v607_v14 }
  0xa5   : > { %1081 = shalt.err (!%p1078_p4)
}
  0xa6   : > { %s1082_s4 = scalar_lea.hbm %s1665_s3, 64  ;;  %s1086_s9 = scalar_lea.hbm %s1917_s11, 128 }
  0xa7   : > { %p1083_p3 = scmp.ne.s32.totalorder %s1665_s3, %s1082_s4  ;;  %p1087_p10 = scmp.lt.u32.totalorder %s1665_s3, %s1917_s11 }
  0xa8   : > { %p1088_p1 = scmp.lt.u32.totalorder %s1086_s9, %s1082_s4  ;;  %p1090_p11 = scmp.lt.u32.totalorder %s1082_s4, %s1665_s3 }
  0xa9   : > { %p1084_p6 = pnand %p1083_p3, %p1918_p9 }
  0xaa   : > { %p1089_p2 = por %p1088_p1, %p1087_p10 }
  0xab   : > { %p1085_p5 = pneg %p1084_p6 }
  0xac   : > { %p1091_p8 = por %p1090_p11, %p1089_p2 }
  0xae   : > { %p1092_p12 = pnand %p1091_p8, %p1085_p5 }
  0xb0   : > { %1095 = shalt.err (!%p1092_p12)
}
  0xb1   : > { %869 = dma.vmem_to_hbm [thread:$0]  (%p1918_p9), %s1667_s8, 64, %s1665_s3, %s622_s12   ;;  %v1007_v23 = vpop.eup %1006  ;;  %1026 = vpow2.f32 %v518_v13  ;;  %v356_v59 = vsel %vm352_vm0, %v1514_v6, 0.0  ;;  %v357_v61 = vsel %vm353_vm1, %v1517_v7, 0.0  ;;  %v358_v62 = vsel %vm354_vm2, %v1529_v10, 0.0 }
  0xb2   : > { %v1009_v24 = vpop.eup %1008  ;;  %1028 = vpow2.f32 %v520_v19  ;;  %v359_v63 = vsel %vm355_vm3, %v1541_v16, 0.0  ;;  %v392_v0 = vsel %vm388_vm4, %v1523_v8, %v356_v59  ;;  %v393_v6 = vsel %vm389_vm5, %v1526_v9, %v357_v61  ;;  %s657_s28 = sshll.u32 %s1500_s18, 4  ;;  %s1919_s30 = sld [smem:[#allocation28_spill]]  ;;  %s1795_s28 = int_to_ptr.vmem [resolvable:$true] %s657_s28 }
  0xb3   : > { %v1011_v25 = vpop.eup %1010  ;;  %v492_v26 = vadd.f32 %v1009_v24, %v1001_v17  ;;  %1030 = vpow2.f32 %v522_v21  ;;  %v394_v7 = vsel %vm390_vm6, %v1538_v15, %v358_v62  ;;  %v395_v10 = vsel %vm391_vm7, %v1545_v18, %v359_v63  ;;  %s627_s12 = scalar_lea.sflag [#allocation9], %s1495_s2  ;;  %s1096_s20 = scalar_lea.vmem %s1795_s28, 64 }
  0xb4   : > { %v1013_v28 = vpop.eup %1012  ;;  %v493_v29 = vadd.f32 %v1011_v25, %v1003_v20  ;;  %v428_v16 = vsel %vm424_vm8, %v1565_v27, %v392_v0  ;;  %vm460_vm12 = vcmp.eq.s32.totalorder %v1505_v2, 3  ;;  %v429_v8 = vsel %vm425_vm9, %v1571_v31, %v393_v6  ;;  %p1097_p13 = scmp.ne.s32.totalorder %s1795_s28, %s1096_s20  ;;  %s1261_s21 = smov [#allocation8]  }
  0xb5   : > { %v1015_v30 = vpop.eup %1014  ;;  %v494_v34 = vadd.f32 %v1013_v28, %v1005_v22  ;;  %vm461_vm13 = vcmp.eq.s32.totalorder %v1507_v3, 3  ;;  %v430_v15 = vsel %vm426_vm10, %v1574_v32, %v394_v7  ;;  %vm462_vm14 = vcmp.eq.s32.totalorder %v1509_v4, 3  ;;  %s1100_s27 = sshll.u32 %s1261_s21, 4  ;;  %s1101_s27 = int_to_ptr.vmem [resolvable:$false] %s1100_s27 }
  0xb6   : > { %v1017_v35 = vpop.eup %1016  ;;  %v495_v36 = vadd.f32 %v1015_v30, %v1007_v23  ;;  %v431_v27 = vsel %vm427_vm11, %v1577_v33, %v395_v10  ;;  %vm463_vm15 = vcmp.eq.s32.totalorder %v1511_v5, 3  ;;  %v464_v31 = vsel %vm460_vm12, %v1589_v43, %v428_v16  ;;  %p1098_p7 = pnand %p1097_p13, %p1918_p9  ;;  %s1102_s15 = scalar_lea.vmem %s1101_s27, 128 }
  0xb7   : > { %v1019_v37 = vpop.eup %1018  ;;  %v508_v38 = vadd.f32 %v1017_v35, %v492_v26  ;;  %v465_v32 = vsel %vm461_vm13, %v1592_v44, %v429_v8  ;;  %v466_v19 = vsel %vm462_vm14, %v1595_v45, %v430_v15  ;;  %v467_v43 = vsel %vm463_vm15, %v1604_v49, %v431_v27  ;;  %p1103_p4 = scmp.lt.s32.totalorder %s1795_s28, %s1101_s27  ;;  %p1104_p3 = scmp.lt.s32.totalorder %s1102_s15, %s1096_s20 }
  0xb8   : > { %v1021_v39 = vpop.eup %1020  ;;  %v509_v40 = vadd.f32 %v1019_v37, %v493_v29  ;;  %s1792_s3 = scalar_lea.hbm %s1919_s30, %s859_s29  ;;  %p1099_p0 = pneg %p1098_p7 }
  0xb9   : > { %v1023_v41 = vpop.eup %1022  ;;  %v510_v42 = vadd.f32 %v1021_v39, %v494_v34  ;;  %p1105_p6 = por %p1104_p3, %p1103_p4 }
  0xba   : > { %v1025_v46 = vpop.eup %1024  ;;  %v511_v47 = vadd.f32 %v1023_v41, %v495_v36 }
  0xbb   : > { %v1027_v48 = vpop.eup %1026  ;;  %v524_v50 = vadd.f32 %v1025_v46, %v508_v38  ;;  %p1106_p5 = pnand %p1105_p6, %p1099_p0 }
  0xbc   : > { %v1029_v51 = vpop.eup %1028  ;;  %v525_v52 = vadd.f32 %v1027_v48, %v509_v40 }
  0xbd   : > { %v1031_v53 = vpop.eup %1030  ;;  %v526_v57 = vadd.f32 %v1029_v51, %v510_v42  ;;  %1032 = vlog2.f32 %v524_v50 }
  0xbe   : > { %v527_v58 = vadd.f32 %v1031_v53, %v511_v47  ;;  %1034 = vlog2.f32 %v525_v52 }
  0xbf   : > { %1036 = vlog2.f32 %v526_v57 }
  0xc0   : > { %1038 = vlog2.f32 %v527_v58 }
  0xc7   : > { %v1033_v1 = vpop.eup %1032 }
  0xc8   : > { %v1035_v9 = vpop.eup %1034  ;;  %v529_v18 = vmul.f32 0.6931472, %v1033_v1 }
  0xc9   : > { %v1037_v11 = vpop.eup %1036  ;;  %v531_v12 = vmul.f32 0.6931472, %v1035_v9 }
  0xca   : > { %v1039_v13 = vpop.eup %1038  ;;  %v533_v14 = vmul.f32 0.6931472, %v1037_v11  ;;  %v536_v17 = vadd.f32 %v529_v18, %v1610_v54  ;;  %v609_v18 = vld [vmem:[%s1500_s18] sm:$0x1]  ;;  %v612_v11 = vld [vmem:[%s1500_s18 + $0x1] sm:$0x1] }
  0xcb   : > { %v535_v33 = vmul.f32 0.6931472, %v1039_v13  ;;  %v537_v20 = vadd.f32 %v531_v12, %v1613_v55 }
  0xcc   : > { %v538_v21 = vadd.f32 %v533_v14, %v1616_v56  ;;  %v540_v22 = vsub.f32 %v536_v17, %v464_v31 }
  0xcd   : > { %v539_v23 = vadd.f32 %v535_v33, %v1619_v60  ;;  %v541_v44 = vsub.f32 %v537_v20, %v465_v32  ;;  %v615_v32 = vld [vmem:[%s1500_s18 + $0x2] sm:$0x1]  ;;  %v618_v20 = vld [vmem:[%s1500_s18 + $0x3] sm:$0x1] }
  0xce   : > { %v542_v24 = vsub.f32 %v538_v21, %v466_v19  ;;  %v544_v54 = vsel %vm352_vm0, %v540_v22, 0.0  ;;  %v558_v45 = vsel %vm388_vm4, %v540_v22, 0.0  ;;  %v572_v55 = vsel %vm424_vm8, %v540_v22, 0.0 }
  0xcf   : > { %v543_v25 = vsub.f32 %v539_v23, %v467_v43  ;;  %v545_v49 = vsel %vm353_vm1, %v541_v44, 0.0  ;;  %v559_v56 = vsel %vm389_vm5, %v541_v44, 0.0  ;;  %v573_v60 = vsel %vm425_vm9, %v541_v44, 0.0 }
  0xd0   : > { %v546_v26 = vsel %vm354_vm2, %v542_v24, 0.0  ;;  %v548_v28 = vadd.f32 %v545_v49, %v544_v54  ;;  %v560_v29 = vsel %vm390_vm6, %v542_v24, 0.0  ;;  %v562_v30 = vadd.f32 %v559_v56, %v558_v45 }
  0xd1   : > { %v547_v34 = vsel %vm355_vm3, %v543_v25, 0.0  ;;  %v561_v35 = vsel %vm391_vm7, %v543_v25, 0.0  ;;  %v574_v36 = vsel %vm426_vm10, %v542_v24, 0.0  ;;  %v576_v39 = vadd.f32 %v573_v60, %v572_v55 }
  0xd2   : > { %v549_v37 = vadd.f32 %v548_v28, %v546_v26  ;;  %v563_v38 = vadd.f32 %v562_v30, %v560_v29  ;;  %v586_v40 = vsel %vm460_vm12, %v540_v22, 0.0  ;;  %v575_v41 = vsel %vm427_vm11, %v543_v25, 0.0 }
  0xd3   : > { %v587_v42 = vsel %vm461_vm13, %v541_v44, 0.0  ;;  %v588_v46 = vsel %vm462_vm14, %v542_v24, 0.0  ;;  %v577_v50 = vadd.f32 %v576_v39, %v574_v36  ;;  %v589_v52 = vsel %vm463_vm15, %v543_v25, 0.0 }
  0xd4   : > { %v550_v47 = vadd.f32 %v549_v37, %v547_v34  ;;  %v564_v48 = vadd.f32 %v563_v38, %v561_v35  ;;  %v590_v51 = vadd.f32 %v587_v42, %v586_v40 }
  0xd5   : > { %v578_v2 = vadd.f32 %v577_v50, %v575_v41 }
  0xd6   : > { %v551_v53 = vrot.slane %v550_v47, 4  ;;  %v565_v57 = vrot.slane %v564_v48, 4  ;;  %v591_v58 = vadd.f32 %v590_v51, %v588_v46 }
  0xd7   : > { %v579_v3 = vrot.slane %v578_v2, 4 }
  0xd8   : > { %v552_v59 = vadd.f32 %v551_v53, %v550_v47  ;;  %v566_v61 = vadd.f32 %v565_v57, %v564_v48  ;;  %v592_v62 = vadd.f32 %v591_v58, %v589_v52 }
  0xd9   : > { %v580_v0 = vadd.f32 %v579_v3, %v578_v2 }
  0xda   : > { %v553_v63 = vrot.slane %v552_v59, 2  ;;  %v567_v4 = vrot.slane %v566_v61, 2  ;;  %v593_v6 = vrot.slane %v592_v62, 4 }
  0xdb   : > { %v581_v16 = vrot.slane %v580_v0, 2 }
  0xdc   : > { %v554_v7 = vadd.f32 %v553_v63, %v552_v59  ;;  %v568_v10 = vadd.f32 %v567_v4, %v566_v61  ;;  %v594_v5 = vadd.f32 %v593_v6, %v592_v62 }
  0xdd   : > { %v582_v9 = vadd.f32 %v581_v16, %v580_v0 }
  0xde   : > { %v555_v1 = vrot.slane %v554_v7, 1  ;;  %v569_v8 = vrot.slane %v568_v10, 1  ;;  %v595_v15 = vrot.slane %v594_v5, 2 }
  0xdf   : > { %v583_v12 = vrot.slane %v582_v9, 1 }
  0xe0   : > { %v556_v27 = vadd.f32 %v555_v1, %v554_v7  ;;  %v570_v31 = vadd.f32 %v569_v8, %v568_v10  ;;  %v596_v13 = vadd.f32 %v595_v15, %v594_v5 }
  0xe1   : > { %v584_v19 = vadd.f32 %v583_v12, %v582_v9 }
  0xe2   : > { %v610_v14 = vadd.f32 %v609_v18, %v556_v27  ;;  %v613_v17 = vadd.f32 %v612_v11, %v570_v31  ;;  %v597_v33 = vrot.slane %v596_v13, 1 }
  0xe3   : > { %v616_v43 = vadd.f32 %v615_v32, %v584_v19 }
  0xe4   : > { %611 = vst [vmem:[%s1500_s18] sm:$0x1] %v610_v14  ;;  %614 = vst [vmem:[%s1500_s18 + $0x1] sm:$0x1] %v613_v17  ;;  %v598_v21 = vadd.f32 %v597_v33, %v596_v13 }
  0xe5   : > { %617 = vst [vmem:[%s1500_s18 + $0x2] sm:$0x1] %v616_v43 }
  0xe6   : > { %v619_v22 = vadd.f32 %v618_v20, %v598_v21 }
  0xe8   : > { %620 = vst [vmem:[%s1500_s18 + $0x3] sm:$0x1] %v619_v22 }
  0xe9   : > { %1109 = shalt.err (!%p1106_p5)
}
  0xea   : > { %s1110_s2 = scalar_lea.hbm %s1792_s3, 64  ;;  %s1114_s14 = scalar_lea.hbm %s1919_s30, 128 }
  0xeb   : > { %p1111_p10 = scmp.ne.s32.totalorder %s1792_s3, %s1110_s2  ;;  %p1115_p11 = scmp.lt.u32.totalorder %s1792_s3, %s1919_s30 }
  0xec   : > { %p1116_p8 = scmp.lt.u32.totalorder %s1114_s14, %s1110_s2  ;;  %p1118_p13 = scmp.lt.u32.totalorder %s1110_s2, %s1792_s3 }
  0xed   : > { %p1112_p1 = pnand %p1111_p10, %p1918_p9 }
  0xee   : > { %p1117_p12 = por %p1116_p8, %p1115_p11 }
  0xef   : > { %p1113_p2 = pneg %p1112_p1 }
  0xf0   : > { %p1119_p7 = por %p1118_p13, %p1117_p12 }
  0xf2   : > { %p1120_p0 = pnand %p1119_p7, %p1113_p2 }
  0xf4   : > { %1123 = shalt.err (!%p1120_p0)
}
  0xf5   : > { %870 = dma.vmem_to_hbm [thread:$0]  (%p1918_p9), %s1795_s28, 64, %s1792_s3, %s627_s12  }
  0xf6 PF: > { %s1920_s7 = sld [smem:[#allocation16_spill]]  ;;  %s1921_s9 = sld [smem:[#allocation26_spill]] }
  0xf7   : > { %p880_p4 = scmp.ge.s32.totalorder %s1250_s25, 2 }
  0xfc   : > { %s669_s26 = sand.u32 1, %s1920_s7   ;;  %p1922_p3 = scmp.ne.s32.totalorder %s1921_s9, 0 }
  0xfd   : > { %s670_s22 = scalar_lea.sflag [#allocation4], %s669_s26 }
  0xfe   : > { %p874_p6 = pnand %p880_p4, %p1922_p3 }
 0x100   : > { %1189 = dma.done.wait (!%p874_p6), %s670_s22, 64  }
 0x101   : > { %1191 = vsyncadd (!%p874_p6), %s670_s22, 4294967232  ;;  %s679_s8 = scalar_lea.sflag [#allocation9], %s669_s26 }
 0x102   : > { %1193 = dma.done.wait (!%p874_p6), %s679_s8, 64  }
 0x103   : > { %1195 = vsyncadd (!%p874_p6), %s679_s8, 4294967232  ;;  %s26_s25 = sadd.s32 1, %s1250_s25   ;;  %s1924_s28 = sld [smem:[#allocation17_spill]] }
 0x104   : > { %p1825_p5 = scmp.ge.s32.totalorder %s26_s25, 6   ;;  %s1925_s14 = sld [smem:[#allocation24_spill]] }
 0x105   : > { %s1926_s5 = sld [smem:[#allocation23_spill]]  ;;  %s1927_s3 = sld [smem:[#allocation18_spill]] }
 0x106   : > { %s1928_s20 = sld [smem:[#allocation22_spill]]  ;;  %s1929_s27 = sld [smem:[#allocation20_spill]] }
 0x107   : > { %s1930_s2 = sld [smem:[#allocation21_spill]]  ;;  %s1931_s12 = smov %s1202_s13 }
 0x108   : > { %s1933_s15 = smov %s1214_s16  ;;  %s1934_s16 = smov %s1218_s17 }
 0x109   : > { %s1932_s13 = smov %s1924_s28  ;;  %s1936_s18 = smov %s1226_s19 }
 0x10a   : > { %s1938_s21 = smov %s1242_s23  ;;  %s1939_s22 = smov %s1246_s24 }
 0x10b   : > { %s1935_s17 = smov %s1926_s5  ;;  %s1937_s19 = smov %s1927_s3 }
 0x10c   : > { %s1940_s23 = smov %s1929_s27  ;;  %25 = sbr.rel (!%p1825_p5) target bundleno = 17 (0x11), region = 115 }
 0x10d   : > { %s1941_s24 = smov %s1930_s2 }
 0x113   :  { %684 = vsyncpa [#allocation3], 1 }
 0x114   :  { %686 = vsyncpa [#allocation3 + $0x1], 1 }
 0x115   :  { %687 = vsyncpa [#allocation6], 1 }
 0x116   :  { %689 = vsyncpa [#allocation6 + $0x1], 1 }
 0x117   :  { %690 = vsyncpa [#allocation4], 1 }
 0x118   :  { %692 = vsyncpa [#allocation4 + $0x1], 1 }
 0x119   :  { %693 = vsyncpa [#allocation9], 1 }
 0x11a   :  { %695 = vsyncpa [#allocation9 + $0x1], 1 }

</bundles_post_ra>
